<compile_context>
chip_gen: v5e
topology: v5e:2x2
jax: 0.10.0
libtpu: 0.0.40
codegen_flags: <defaults>
</compile_context>

<pallas_src>
import functools
import math

import jax
import jax.numpy as jnp
from jax.experimental import pallas as pl
from jax.experimental.pallas import tpu as pltpu


def _round_up(x, m):
    return ((x + m - 1) // m) * m


def _pick_tile(dim, candidates):
    for c in candidates:
        if dim % c == 0:
            return c
    return dim


def _vmem_limit_bytes():
    # Generation-aware scoped-VMEM budget: ~100 MiB on v5e/v6e (128 MiB physical),
    # conservative on v7x (64 MiB physical).
    try:
        cap = pltpu.get_tpu_info().vmem_capacity_bytes
    except Exception:
        cap = 64 << 20
    return int(min(100 << 20, max(32 << 20, cap - (28 << 20))))


def _spectral_kernel(*refs, has_bias):
    if has_bias:
        x_ref, base_ref, ds_ref, de_ref, b_ref, o_ref, acc_ref = refs
    else:
        x_ref, base_ref, ds_ref, de_ref, o_ref, acc_ref = refs
        b_ref = None

    kk = pl.program_id(2)  # reduction (in_dim) axis, last in the grid

    @pl.when(kk == 0)
    def _():
        acc_ref[...] = jnp.zeros_like(acc_ref)

    # Effective-weight tile on the VPU: base * (diag_start - diag_end)  -> (tk, tn)
    w = base_ref[...] * (ds_ref[...] - de_ref[...])
    # MXU matmul, f32 accumulation.
    acc_ref[...] += jnp.dot(x_ref[...], w, preferred_element_type=jnp.float32)

    @pl.when(kk == pl.num_programs(2) - 1)
    def _():
        out = acc_ref[...]
        if b_ref is not None:
            out = out + b_ref[...].astype(jnp.float32)
        o_ref[...] = out.astype(o_ref.dtype)


def spectral_forward(x, base, diag_start, diag_end, bias=None, *, compute_dtype=None):
    """out = x @ (base * (diag_start - diag_end)) [+ bias]

    x: (B, in_dim); base: (in_dim, out_dim); diag_start: (in_dim, 1);
    diag_end: (1, out_dim); bias: (out_dim,) or None.
    compute_dtype: dtype fed to the MXU (e.g. jnp.bfloat16); accumulation is f32.
    """
    B, K = x.shape
    Kb, N = base.shape
    assert Kb == K
    out_dtype = x.dtype
    cdt = jnp.dtype(compute_dtype) if compute_dtype is not None else x.dtype

    # Pad to TPU-friendly shapes: sublane (8) on B, lanes (128) on in/out dims.
    # Zero padding is semantics-preserving (padded rows/cols contribute 0).
    Bp, Kp, Np = _round_up(B, 8), _round_up(K, 128), _round_up(N, 128)

    def pad2(a, shape):
        a = a.astype(cdt)
        if a.shape == shape:
            return a
        return jnp.zeros(shape, cdt).at[: a.shape[0], : a.shape[1]].set(a)

    x_p = pad2(x, (Bp, Kp))
    base_p = pad2(base, (Kp, Np))
    ds_p = pad2(diag_start, (Kp, 1))
    de_p = pad2(diag_end, (1, Np))
    operands = [x_p, base_p, ds_p, de_p]

    # Tiles: large enough to amortize the ~0.35us per-step overhead, small enough
    # that (x + base + out) double-buffered + acc stays well under v7x VMEM.
    tm = _pick_tile(Bp, (256, 128, 64, 32, 16, 8))
    tk = _pick_tile(Kp, (512, 256, 128))
    tn = _pick_tile(Np, (512, 256, 128))
    grid = (Bp // tm, Np // tn, Kp // tk)

    in_specs = [
        pl.BlockSpec((tm, tk), lambda i, j, k: (i, k)),   # x
        pl.BlockSpec((tk, tn), lambda i, j, k: (k, j)),   # base
        pl.BlockSpec((tk, 1), lambda i, j, k: (k, 0)),    # diag_start (tiny)
        pl.BlockSpec((1, tn), lambda i, j, k: (0, j)),    # diag_end   (tiny)
    ]
    if bias is not None:
        operands.append(pad2(bias.reshape(1, -1), (1, Np)))
        in_specs.append(pl.BlockSpec((1, tn), lambda i, j, k: (0, j)))

    out = pl.pallas_call(
        functools.partial(_spectral_kernel, has_bias=bias is not None),
        out_shape=jax.ShapeDtypeStruct((Bp, Np), out_dtype),
        grid_spec=pltpu.PrefetchScalarGridSpec(
            num_scalar_prefetch=0,
            grid=grid,
            in_specs=in_specs,
            out_specs=pl.BlockSpec((tm, tn), lambda i, j, k: (i, j)),
            scratch_shapes=[pltpu.VMEM((tm, tn), jnp.float32)],
        ),
        compiler_params=pltpu.CompilerParams(
            dimension_semantics=("parallel", "parallel", "arbitrary"),
            vmem_limit_bytes=_vmem_limit_bytes(),
        ),
    )(*operands)

    return out[:B, :N]


def init_spectral_params(key, in_dim, out_dim, dtype=jnp.float32):
    """Re-implementation of Spectral.reset_parameters().

    base is stored as (in_dim, out_dim); PyTorch fan_in = dim-1 size = out_dim,
    fan_out = dim-0 size = in_dim.  kaiming_uniform_(a=sqrt(5)) -> bound = 1/sqrt(fan_in).
    """
    k_base, k_start, k_end = jax.random.split(key, 3)
    fan_in, fan_out = out_dim, in_dim
    bound_in = 1.0 / math.sqrt(fan_in) if fan_in > 0 else 0.0
    bound_out = 1.0 / math.sqrt(fan_out) if fan_out > 0 else 0.0
    base = jax.random.uniform(k_base, (in_dim, out_dim), dtype, -bound_in, bound_in)
    diag_start = jax.random.uniform(k_start, (in_dim, 1), dtype, -bound_in, bound_in)
    diag_end = jax.random.uniform(k_end, (1, out_dim), dtype, -bound_out, bound_out)
    return base, diag_start, diag_end


if __name__ == "__main__":
    key = jax.random.PRNGKey(0)
    k_p1, k_x1, k_p2, k_x2 = jax.random.split(key, 4)

    # --- small demo at the module's natural scale (f32, single grid step) ---
    B, in_dim, out_dim = 8, 32, 32
    base, diag_start, diag_end = init_spectral_params(k_p1, in_dim, out_dim)
    x = jax.random.normal(k_x1, (B, in_dim), jnp.float32)

    out = spectral_forward(x, base, diag_start, diag_end)
    out = jax.block_until_ready(out)
    ref = x @ (base * (diag_start - diag_end))
    assert out.shape == (B, out_dim)
    assert jnp.allclose(out, ref, atol=1e-5, rtol=1e-5), "f32 mismatch vs reference"

    # --- larger case: multi-step (B, out, in) grid, f32 accumulator, padding of a
    #     non-128-multiple out_dim, and bf16 operands with f32 accumulation ---
    B2, in2, out2 = 256, 384, 320
    base2, ds2, de2 = init_spectral_params(k_p2, in2, out2)
    x2 = jax.random.normal(k_x2, (B2, in2), jnp.float32)

    out2_v = spectral_forward(x2, base2, ds2, de2, compute_dtype=jnp.bfloat16)
    out2_v = jax.block_until_ready(out2_v)
    w2 = base2.astype(jnp.bfloat16) * (ds2.astype(jnp.bfloat16) - de2.astype(jnp.bfloat16))
    ref2 = jnp.dot(x2.astype(jnp.bfloat16), w2,
                   preferred_element_type=jnp.float32).astype(jnp.float32)
    assert out2_v.shape == (B2, out2)
    assert jnp.allclose(out2_v, ref2, atol=5e-3, rtol=5e-2), "bf16 mismatch vs reference"

    # TODO(synk): backward / trainable-flag handling (base_grad/start_grad/end_grad)
    # is a training-time concern, not part of the forward kernel.
    print("KERNEL_OK")
</pallas_src>

<mosaic_0001>
module attributes {stable_mosaic.version = 11 : i64} {
  func.func @_spectral_kernel(%arg0: i32, %arg1: i32, %arg2: i32, %arg3: memref<8x128xf32, #tpu.memory_space<vmem>>, %arg4: memref<128x128xf32, #tpu.memory_space<vmem>>, %arg5: memref<128x1xf32, #tpu.memory_space<vmem>>, %arg6: memref<1x128xf32, #tpu.memory_space<vmem>>, %arg7: memref<8x128xf32, #tpu.memory_space<vmem>>, %arg8: memref<8x128xf32, #tpu.memory_space<vmem>>) attributes {dimension_semantics = [#tpu.dimension_semantics<parallel>, #tpu.dimension_semantics<parallel>, #tpu.dimension_semantics<arbitrary>], iteration_bounds = array<i64: 1, 1, 1>, scalar_prefetch = 0 : i64, scratch_operands = 1 : i64, tpu.core_type = #tpu.core_type<tc>, window_params = [{transform_indices = @transform_0, window_bounds = array<i64: 8, 128>}, {transform_indices = @transform_1, window_bounds = array<i64: 128, 128>}, {transform_indices = @transform_2, window_bounds = array<i64: 128, 1>}, {transform_indices = @transform_3, window_bounds = array<i64: 1, 128>}, {transform_indices = @transform_4, window_bounds = array<i64: 8, 128>}]} {
    %c0_i32 = arith.constant 0 : i32
    %0 = arith.cmpi eq, %arg2, %c0_i32 : i32
    %1 = arith.extui %0 : i1 to i32
    %c0_i32_0 = arith.constant 0 : i32
    %2 = arith.cmpi ne, %1, %c0_i32_0 : i32
    scf.if %2 {
      %cst_14 = arith.constant 0.000000e+00 : f32
      %18 = vector.broadcast %cst_14 : f32 to vector<8x128xf32>
      %c0_15 = arith.constant 0 : index
      %c0_16 = arith.constant 0 : index
      %19 = vector.load %arg8[%c0_15, %c0_16] : memref<8x128xf32, #tpu.memory_space<vmem>>, vector<8x128xf32>
      tpu.vector_store %arg8[%c0_15, %c0_16], %18 {strides = array<i32>} : memref<8x128xf32, #tpu.memory_space<vmem>>, vector<8x128xf32>,
    } else {
    }
    %c0 = arith.constant 0 : index
    %c0_1 = arith.constant 0 : index
    %3 = vector.load %arg4[%c0, %c0_1] : memref<128x128xf32, #tpu.memory_space<vmem>>, vector<128x128xf32>
    %c0_2 = arith.constant 0 : index
    %c0_3 = arith.constant 0 : index
    %4 = vector.load %arg5[%c0_2, %c0_3] : memref<128x1xf32, #tpu.memory_space<vmem>>, vector<128x1xf32>
    %c0_4 = arith.constant 0 : index
    %c0_5 = arith.constant 0 : index
    %5 = vector.load %arg6[%c0_4, %c0_5] : memref<1x128xf32, #tpu.memory_space<vmem>>, vector<1x128xf32>
    %6 = vector.broadcast %4 : vector<128x1xf32> to vector<128x128xf32>
    %7 = vector.broadcast %5 : vector<1x128xf32> to vector<128x128xf32>
    %8 = arith.subf %6, %7 : vector<128x128xf32>
    %9 = arith.mulf %3, %8 : vector<128x128xf32>
    %c0_6 = arith.constant 0 : index
    %c0_7 = arith.constant 0 : index
    %10 = vector.load %arg8[%c0_6, %c0_7] : memref<8x128xf32, #tpu.memory_space<vmem>>, vector<8x128xf32>
    %c0_8 = arith.constant 0 : index
    %c0_9 = arith.constant 0 : index
    %11 = vector.load %arg3[%c0_8, %c0_9] : memref<8x128xf32, #tpu.memory_space<vmem>>, vector<8x128xf32>
    %cst = arith.constant dense<0.000000e+00> : vector<8x128xf32>
    %12 = tpu.matmul %11, %9, %cst {dimension_numbers = #tpu.dot_dimension_numbers<[1], [0], [0], [1], [0, 0, 1, 1], [], []>} : vector<8x128xf32>, vector<128x128xf32>, vector<8x128xf32> -> vector<8x128xf32>
    %13 = arith.addf %10, %12 : vector<8x128xf32>
    %c0_10 = arith.constant 0 : index
    %c0_11 = arith.constant 0 : index
    %14 = vector.load %arg8[%c0_10, %c0_11] : memref<8x128xf32, #tpu.memory_space<vmem>>, vector<8x128xf32>
    tpu.vector_store %arg8[%c0_10, %c0_11], %13 {strides = array<i32>} : memref<8x128xf32, #tpu.memory_space<vmem>>, vector<8x128xf32>,
    %c0_i32_12 = arith.constant 0 : i32
    %15 = arith.cmpi eq, %arg2, %c0_i32_12 : i32
    %16 = arith.extui %15 : i1 to i32
    %c0_i32_13 = arith.constant 0 : i32
    %17 = arith.cmpi ne, %16, %c0_i32_13 : i32
    scf.if %17 {
      %c0_14 = arith.constant 0 : index
      %c0_15 = arith.constant 0 : index
      %18 = vector.load %arg8[%c0_14, %c0_15] : memref<8x128xf32, #tpu.memory_space<vmem>>, vector<8x128xf32>
      %c0_16 = arith.constant 0 : index
      %c0_17 = arith.constant 0 : index
      %19 = vector.load %arg7[%c0_16, %c0_17] : memref<8x128xf32, #tpu.memory_space<vmem>>, vector<8x128xf32>
      tpu.vector_store %arg7[%c0_16, %c0_17], %18 {strides = array<i32>} : memref<8x128xf32, #tpu.memory_space<vmem>>, vector<8x128xf32>,
    } else {
    }
    return
  }
  func.func @transform_0(%arg0: i32, %arg1: i32, %arg2: i32) -> (i32, i32) {
    %c0_i32 = arith.constant 0 : i32
    return %arg0, %arg2 : i32, i32
  }
  func.func @transform_1(%arg0: i32, %arg1: i32, %arg2: i32) -> (i32, i32) {
    %c0_i32 = arith.constant 0 : i32
    return %arg2, %arg1 : i32, i32
  }
  func.func @transform_2(%arg0: i32, %arg1: i32, %arg2: i32) -> (i32, i32) {
    %c0_i32 = arith.constant 0 : i32
    %c0_i32_0 = arith.constant 0 : i32
    return %arg2, %c0_i32 : i32, i32
  }
  func.func @transform_3(%arg0: i32, %arg1: i32, %arg2: i32) -> (i32, i32) {
    %c0_i32 = arith.constant 0 : i32
    %c0_i32_0 = arith.constant 0 : i32
    return %c0_i32, %arg1 : i32, i32
  }
  func.func @transform_4(%arg0: i32, %arg1: i32, %arg2: i32) -> (i32, i32) {
    %c0_i32 = arith.constant 0 : i32
    return %arg0, %arg1 : i32, i32
  }
}

</mosaic_0001>

<bundles_post_ra>
// kernel: tpu_custom_call.1
= control target key start
LH: loop header
LB: loop body
LE: loop exit
PB: predicated region body
PF: predicated region fallthrough
CT: control target
= control target key end

     0   :  { %9 = vsyncpa [#allocation4], 0  ;;  %s441_s0 = inlined_call_operand.hbm [shape: f32[8,128], index: 0, kind: input, shape index: {}]   ;;  %s442_s1 = inlined_call_operand.vmem [shape: f32[128,128], index: 1, kind: input, shape index: {}]   ;;  %s443_s2 = inlined_call_operand.vmem [shape: f32[128,1], index: 2, kind: input, shape index: {}]   ;;  %s444_s3 = inlined_call_operand.vmem [shape: f32[1,128], index: 3, kind: input, shape index: {}]   ;;  %s445_s4 = inlined_call_operand.hbm [shape: f32[8,128], index: 4, kind: output, shape index: {}]  }
   0x1   :  { %10 = vsyncpa [#allocation5], 0  ;;  %s16_s17 = sshll.u32 %s441_s0, 4  ;;  %s290_s18 = smov [#allocation3]   ;;  %s17_s17 = int_to_ptr.hbm [resolvable:$true] %s16_s17 }
   0x2   :  { %s18_s19 = sshll.u32 %s290_s18, 4  ;;  %s19_s19 = int_to_ptr.vmem [resolvable:$true] %s18_s19 }
   0x3   :  { %21 = dma.hbm_to_vmem [thread:$0]  %s17_s17, 128, %s19_s19, [#allocation4]  }
   0x4   :  { %286 = dma.done.wait [#allocation4], 128  }
   0x5   :  { %287 = vsyncadd [#allocation4], 4294967168  ;;  %v291_v0 = vmov 0   ;;  %v68_v1 = vld [vmem:[%s443_s2 + $0x78] sm:$0xff]  ;;  %v66_v2 = vld [vmem:[%s443_s2 + $0x68] sm:$0xff]  ;;  %s292_s28 = smov [#allocation6]  }
   0x6   :  { %236 = vset.pattern.permute.xlu2 %v291_v0  ;;  %235 = vset.pattern.permute.xlu1 %v291_v0  ;;  %v64_v3 = vld [vmem:[%s443_s2 + $0x58] sm:$0xff]  ;;  %v67_v4 = vld [vmem:[%s443_s2 + $0x70] sm:$0xff]  ;;  %v65_v5 = vld [vmem:[%s443_s2 + $0x60] sm:$0xff]  ;;  %s221_s5 = sshll.u32 %s445_s4, 4  ;;  %s222_s5 = int_to_ptr.hbm [resolvable:$true] %s221_s5 }
   0x7   :  { %234 = vset.pattern.permute.xlu0 %v291_v0  ;;  %137 = vperm.xlu1 %235, %v66_v2   ;;  %v63_v6 = vld [vmem:[%s443_s2 + $0x50] sm:$0xff]  ;;  %v62_v7 = vld [vmem:[%s443_s2 + $0x48] sm:$0xff]  ;;  %v61_v8 = vld [vmem:[%s443_s2 + $0x40] sm:$0xff] }
   0x8   :  { %147 = vperm.xlu0 %234, %v68_v1   ;;  %127 = vperm.xlu2 %236, %v64_v3   ;;  %v60_v9 = vld [vmem:[%s443_s2 + $0x38] sm:$0xff]  ;;  %v59_v10 = vld [vmem:[%s443_s2 + $0x30] sm:$0xff]  ;;  %v58_v11 = vld [vmem:[%s443_s2 + $0x28] sm:$0xff] }
   0x9   :  { %v57_v12 = vld [vmem:[%s443_s2 + $0x20] sm:$0xff]  ;;  %v56_v13 = vld [vmem:[%s443_s2 + $0x18] sm:$0xff]  ;;  %v55_v14 = vld [vmem:[%s443_s2 + $0x10] sm:$0xff] }
   0xa   :  { %v54_v15 = vld [vmem:[%s443_s2 + $0x8] sm:$0xff]  ;;  %v53_v16 = vld [vmem:[%s443_s2] sm:$0xff]  ;;  %v52_v21 = vld [vmem:[%s442_s1 + $0x78] sm:$0xff] }
   0xb   :  { %v372_v18 = vld [vmem:[%s444_s3] ss:$0 sm:$0xff]  ;;  %v51_v27 = vld [vmem:[%s442_s1 + $0x70] sm:$0xff]  ;;  %v50_v30 = vld [vmem:[%s442_s1 + $0x68] sm:$0xff]  ;;  %s219_s3 = sshll.u32 %s292_s28, 4  ;;  %s220_s3 = int_to_ptr.vmem [resolvable:$true] %s219_s3 }
   0xc   :  { %v49_v34 = vld [vmem:[%s442_s1 + $0x60] sm:$0xff]  ;;  %v48_v37 = vld [vmem:[%s442_s1 + $0x58] sm:$0xff]  ;;  %v47_v42 = vld [vmem:[%s442_s1 + $0x50] sm:$0xff] }
   0xd   :  { %v46_v45 = vld [vmem:[%s442_s1 + $0x48] sm:$0xff]  ;;  %v45_v48 = vld [vmem:[%s442_s1 + $0x40] sm:$0xff]  ;;  %v44_v52 = vld [vmem:[%s442_s1 + $0x38] sm:$0xff] }
   0xe   :  { %v43_v56 = vld [vmem:[%s442_s1 + $0x30] sm:$0xff]  ;;  %v42_v60 = vld [vmem:[%s442_s1 + $0x28] sm:$0xff]  ;;  %v41_v63 = vld [vmem:[%s442_s1 + $0x20] sm:$0xff] }
   0xf   :  { %132 = vperm.xlu1 %235, %v65_v5   ;;  %v40_v5 = vld [vmem:[%s442_s1 + $0x18] sm:$0xff] }
  0x10   :  { %142 = vperm.xlu0 %234, %v67_v4   ;;  %122 = vperm.xlu2 %236, %v63_v6  }
  0x17   :  { %112 = vperm.xlu1 %235, %v61_v8   ;;  %v39_v8 = vld [vmem:[%s442_s1 + $0x10] sm:$0xff] }
  0x18   :  { %117 = vperm.xlu0 %234, %v62_v7   ;;  %107 = vperm.xlu2 %236, %v60_v9  }
  0x1f   :  { %97 = vperm.xlu1 %235, %v58_v11   ;;  %v38_v11 = vld [vmem:[%s442_s1 + $0x8] sm:$0xff] }
  0x20   :  { %102 = vperm.xlu0 %234, %v59_v10   ;;  %92 = vperm.xlu2 %236, %v57_v12  }
  0x27   :  { %82 = vperm.xlu1 %235, %v55_v14  }
  0x28   :  { %87 = vperm.xlu0 %234, %v56_v13   ;;  %77 = vperm.xlu2 %236, %v54_v15   ;;  %v37_v15 = vld [vmem:[%s442_s1] sm:$0xff] }
  0x30   :  { %72 = vperm.xlu0 %234, %v53_v16  }
  0x62   :  { %v128_v17 = vpop.permute.xlu2 %127 }
  0x63   :  { %v164_v35 = vsub.f32 %v128_v17, %v372_v18 }
  0x65   :  { %v180_v44 = vmul.f32 %v164_v35, %v48_v37 }
  0x6a   :  { %v123_v22 = vpop.permute.xlu2 %122 }
  0x6b   :  { %v163_v38 = vsub.f32 %v123_v22, %v372_v18 }
  0x6d   :  { %v179_v47 = vmul.f32 %v163_v38, %v47_v42 }
  0x72   :  { %v108_v31 = vpop.permute.xlu2 %107 }
  0x73   :  { %v160_v49 = vsub.f32 %v108_v31, %v372_v18 }
  0x75   :  { %v176_v59 = vmul.f32 %v160_v49, %v44_v52 }
  0x79   :  { %v138_v20 = vpop.permute.xlu1 %137 }
  0x7a   :  { %v148_v19 = vpop.permute.xlu0 %147  ;;  %v166_v28 = vsub.f32 %v138_v20, %v372_v18  ;;  %v93_v50 = vpop.permute.xlu2 %92 }
  0x7b   :  { %v168_v23 = vsub.f32 %v148_v19, %v372_v18  ;;  %v157_v61 = vsub.f32 %v93_v50, %v372_v18  ;;  %v186_v19 = vld [vmem:[#allocation3] sm:$0xff] }
  0x7c   :  { %v182_v36 = vmul.f32 %v166_v28, %v50_v30 }
  0x7d   :  { %v184_v24 = vmul.f32 %v168_v23, %v52_v21  ;;  %v173_v2 = vmul.f32 %v157_v61, %v41_v63 }
  0x7f   :  { %187 = vmatpush.msra.mxu0 %v184_v24 }
  0x81   :  { %v133_v26 = vpop.permute.xlu1 %132 }
  0x82   :  { %v143_v25 = vpop.permute.xlu0 %142  ;;  %v165_v32 = vsub.f32 %v133_v26, %v372_v18  ;;  %v78_v1 = vpop.permute.xlu2 %77 }
  0x83   :  { %v167_v29 = vsub.f32 %v143_v25, %v372_v18  ;;  %v154_v9 = vsub.f32 %v78_v1, %v372_v18 }
  0x84   :  { %v181_v39 = vmul.f32 %v165_v32, %v49_v34 }
  0x85   :  { %v183_v33 = vmul.f32 %v167_v29, %v51_v27  ;;  %v170_v13 = vmul.f32 %v154_v9, %v38_v11 }
  0x87   :  { %188 = vmatpush.msra.mxu0 %v183_v33 }
  0x89   :  { %189 = vmatpush.msra.mxu0 %v182_v36  ;;  %v113_v41 = vpop.permute.xlu1 %112 }
  0x8a   :  { %v118_v40 = vpop.permute.xlu0 %117  ;;  %v161_v46 = vsub.f32 %v113_v41, %v372_v18 }
  0x8b   :  { %v162_v43 = vsub.f32 %v118_v40, %v372_v18  ;;  %190 = vmatpush.msra.mxu0 %v181_v39 }
  0x8c   :  { %v177_v53 = vmul.f32 %v161_v46, %v45_v48 }
  0x8d   :  { %191 = vmatpush.msra.mxu0 %v180_v44  ;;  %v178_v51 = vmul.f32 %v162_v43, %v46_v45 }
  0x8f   :  { %192 = vmatpush.msra.mxu0 %v179_v47 }
  0x91   :  { %193 = vmatpush.msra.mxu0 %v178_v51  ;;  %v98_v55 = vpop.permute.xlu1 %97 }
  0x92   :  { %v103_v54 = vpop.permute.xlu0 %102  ;;  %v158_v58 = vsub.f32 %v98_v55, %v372_v18 }
  0x93   :  { %v159_v57 = vsub.f32 %v103_v54, %v372_v18  ;;  %194 = vmatpush.msra.mxu0 %v177_v53 }
  0x94   :  { %v174_v0 = vmul.f32 %v158_v58, %v42_v60 }
  0x95   :  { %195 = vmatpush.msra.mxu0 %v176_v59  ;;  %v175_v62 = vmul.f32 %v159_v57, %v43_v56 }
  0x97   :  { %196 = vmatpush.msra.mxu0 %v175_v62 }
  0x99   :  { %197 = vmatpush.msra.mxu0 %v174_v0  ;;  %v83_v4 = vpop.permute.xlu1 %82 }
  0x9a   :  { %v88_v3 = vpop.permute.xlu0 %87  ;;  %v155_v7 = vsub.f32 %v83_v4, %v372_v18 }
  0x9b   :  { %v156_v6 = vsub.f32 %v88_v3, %v372_v18  ;;  %198 = vmatpush.msra.mxu0 %v173_v2 }
  0x9c   :  { %v171_v12 = vmul.f32 %v155_v7, %v39_v8 }
  0x9d   :  { %v172_v10 = vmul.f32 %v156_v6, %v40_v5 }
  0x9f   :  { %199 = vmatpush.msra.mxu0 %v172_v10 }
  0xa1   :  { %200 = vmatpush.msra.mxu0 %v171_v12 }
  0xa2   :  { %v73_v14 = vpop.permute.xlu0 %72 }
  0xa3   :  { %v153_v16 = vsub.f32 %v73_v14, %v372_v18  ;;  %201 = vmatpush.msra.mxu0 %v170_v13 }
  0xa5   :  { %v169_v17 = vmul.f32 %v153_v16, %v37_v15 }
  0xa7   :  { %202 = vmatpush.msra.mxu0 %v169_v17 }
  0xa8   :  { %203 = vmatmul.f32.vlgmr.msra.gmra.mxu0 %v186_v19 }
 0x125   :  { %v204_v20 = vpop.f32.mrf.mxu0 }
 0x126   :  { %213 = vst [vmem:[#allocation6] sm:$0xff] %v204_v20 }
 0x127   :  { %224 = dma.vmem_to_hbm [thread:$0]  %s220_s3, 128, %s222_s5, [#allocation5]  }
 0x128   :  { %288 = dma.done.wait [#allocation5], 128  }
 0x129   :  { %289 = vsyncadd [#allocation5], 4294967168 }
 0x12a   :  { %229 = vsyncpa [#allocation4], 1 }
 0x12b   :  { %230 = vsyncpa [#allocation5], 1 }

</bundles_post_ra>
